<compile_context>
chip_gen: v5e
topology: v5e:2x2
jax: 0.10.0
libtpu: 0.0.40
codegen_flags: <defaults>
</compile_context>

<pallas_src>
import jax
import jax.numpy as jnp
from jax.experimental import pallas as pl
from jax.experimental.pallas import tpu as pltpu

_LANES = 128
_SUBLANES = 8


def _affine_kernel(scale_ref, bias_ref, x_ref, o_ref):
    # scale_ref, bias_ref: (1, 1) f32 scalars in SMEM.
    # x_ref, o_ref:        (block_rows, 128) f32 tiles in VMEM.
    o_ref[...] = x_ref[...] * scale_ref[0, 0] + bias_ref[0, 0]


def _fold_weights(w1, b1, w2, b2):
    # Linear2(Linear1(x)) with no intermediate nonlinearity == a*x + c.
    a = jnp.sum(w2.reshape(-1) * w1.reshape(-1))                    # scalar
    c = jnp.sum(w2.reshape(-1) * b1.reshape(-1)) + b2.reshape(())   # scalar
    return a.astype(jnp.float32), c.astype(jnp.float32)


def model_forward(x, w1, b1, w2, b2, *, max_block_rows=2048):
    """x: (..., 1) float32.  Returns same shape, matching the PyTorch Model.

    max_block_rows=2048 -> 1 MiB blocks; double-buffered in + out uses ~4 MiB
    VMEM, comfortably inside the default scoped limit on v5e/v6e/v7x while
    staying near the measured HBM-roofline sweet spot (>=512-row tiles).
    """
    orig_shape = x.shape
    orig_dtype = x.dtype
    n = x.size
    a, c = _fold_weights(w1, b1, w2, b2)

    xf = jnp.reshape(x, (-1,)).astype(jnp.float32)

    # Lane-dense (rows, 128) layout.  Only pad when n is not 128-aligned
    # (the 128-aligned path is pure metadata reshapes: zero extra HBM traffic).
    pad = (-n) % _LANES
    if pad:
        xf = jnp.pad(xf, (0, pad))
    rows = (n + pad) // _LANES

    if rows <= max_block_rows:
        block_rows = rows                      # single block == full array dims
    else:
        block_rows = (max_block_rows // _SUBLANES) * _SUBLANES
    grid_rows = pl.cdiv(rows, block_rows)      # partial edge block auto-masked

    x2 = xf.reshape(rows, _LANES)
    a2 = a.reshape(1, 1)
    c2 = c.reshape(1, 1)

    out2 = pl.pallas_call(
        _affine_kernel,
        out_shape=jax.ShapeDtypeStruct((rows, _LANES), jnp.float32),
        grid=(grid_rows,),
        in_specs=[
            pl.BlockSpec(memory_space=pltpu.MemorySpace.SMEM),       # scalar a
            pl.BlockSpec(memory_space=pltpu.MemorySpace.SMEM),       # scalar c
            pl.BlockSpec((block_rows, _LANES), lambda i: (i, 0)),    # x tile
        ],
        out_specs=pl.BlockSpec((block_rows, _LANES), lambda i: (i, 0)),
        compiler_params=pltpu.CompilerParams(
            dimension_semantics=("parallel",),   # shard grid across TCs (v7x)
        ),
    )(a2, c2, x2)

    out = out2.reshape(-1)
    if pad:
        out = out[:n]
    return out.reshape(orig_shape).astype(orig_dtype)


def init_params(key):
    # Deterministic init mimicking torch.nn.Linear default U[-1/sqrt(fan_in), +].
    k1, k2, k3, k4 = jax.random.split(key, 4)
    bound1 = 1.0  # fan_in = 1
    w1 = jax.random.uniform(k1, (10, 1), jnp.float32, -bound1, bound1)
    b1 = jax.random.uniform(k2, (10,), jnp.float32, -bound1, bound1)
    bound2 = 1.0 / jnp.sqrt(10.0)  # fan_in = 10
    w2 = jax.random.uniform(k3, (1, 10), jnp.float32, -bound2, bound2)
    b2 = jax.random.uniform(k4, (1,), jnp.float32, -bound2, bound2)
    return w1, b1, w2, b2


if __name__ == "__main__":
    key = jax.random.PRNGKey(0)
    kp, kx1, kx2 = jax.random.split(key, 3)
    w1, b1, w2, b2 = init_params(kp)

    # Reference (un-folded) forward, matching the PyTorch module exactly.
    ref_fn = lambda x: (x @ w1.T + b1) @ w2.T + b2

    # Case 1: exactly the spec's usage, x = [[4.0]]  (padded, single block).
    x_spec = jnp.array([[4.0]], dtype=jnp.float32)
    y_spec = jax.block_until_ready(model_forward(x_spec, w1, b1, w2, b2))
    assert jnp.allclose(y_spec, ref_fn(x_spec), atol=1e-4, rtol=1e-4), (
        y_spec, ref_fn(x_spec))

    # Case 2: small random batch (padded lane-dense path).
    x_small = jax.random.normal(kx1, (4, 1), jnp.float32)
    y_small = jax.block_until_ready(model_forward(x_small, w1, b1, w2, b2))
    assert jnp.allclose(y_small, ref_fn(x_small), atol=1e-4, rtol=1e-4)

    # Case 3: batch not divisible by the block -> multi-step grid with a
    # masked edge block (4736 = 37 rows of 128; block_rows=8 -> grid of 5).
    x_big = jax.random.normal(kx2, (4736, 1), jnp.float32)
    y_big = jax.block_until_ready(
        model_forward(x_big, w1, b1, w2, b2, max_block_rows=8))
    assert jnp.allclose(y_big, ref_fn(x_big), atol=1e-4, rtol=1e-4)

    print("KERNEL_OK")
</pallas_src>

<mosaic_0001>
module attributes {stable_mosaic.version = 11 : i64} {
  func.func @_affine_kernel(%arg0: i32, %arg1: memref<1x1xf32, #tpu.memory_space<smem>>, %arg2: memref<1x1xf32, #tpu.memory_space<smem>>, %arg3: memref<1x128xf32, #tpu.memory_space<vmem>>, %arg4: memref<1x128xf32, #tpu.memory_space<vmem>>) attributes {dimension_semantics = [#tpu.dimension_semantics<parallel>], iteration_bounds = array<i64: 1>, scalar_prefetch = 0 : i64, scratch_operands = 0 : i64, tpu.core_type = #tpu.core_type<tc>, window_params = [{transform_indices = @transform_0, window_bounds = array<i64: 1, 1>}, {transform_indices = @transform_1, window_bounds = array<i64: 1, 1>}, {transform_indices = @transform_2, window_bounds = array<i64: 1, 128>}, {transform_indices = @transform_3, window_bounds = array<i64: 1, 128>}]} {
    %c0 = arith.constant 0 : index
    %c0_0 = arith.constant 0 : index
    %0 = vector.load %arg3[%c0, %c0_0] : memref<1x128xf32, #tpu.memory_space<vmem>>, vector<1x128xf32>
    %c0_1 = arith.constant 0 : index
    %c0_2 = arith.constant 0 : index
    %1 = memref.load %arg1[%c0_1, %c0_2] : memref<1x1xf32, #tpu.memory_space<smem>>
    %2 = vector.broadcast %1 : f32 to vector<1x128xf32>
    %3 = arith.mulf %0, %2 : vector<1x128xf32>
    %c0_3 = arith.constant 0 : index
    %c0_4 = arith.constant 0 : index
    %4 = memref.load %arg2[%c0_3, %c0_4] : memref<1x1xf32, #tpu.memory_space<smem>>
    %5 = vector.broadcast %4 : f32 to vector<1x128xf32>
    %6 = arith.addf %3, %5 : vector<1x128xf32>
    %c0_5 = arith.constant 0 : index
    %c0_6 = arith.constant 0 : index
    %7 = vector.load %arg4[%c0_5, %c0_6] : memref<1x128xf32, #tpu.memory_space<vmem>>, vector<1x128xf32>
    tpu.vector_store %arg4[%c0_5, %c0_6], %6 {strides = array<i32>} : memref<1x128xf32, #tpu.memory_space<vmem>>, vector<1x128xf32>,
    return
  }
  func.func @transform_0(%arg0: i32) -> (i32, i32) {
    %c0_i32 = arith.constant 0 : i32
    %c0_i32_0 = arith.constant 0 : i32
    %c0_i32_1 = arith.constant 0 : i32
    return %c0_i32, %c0_i32_0 : i32, i32
  }
  func.func @transform_1(%arg0: i32) -> (i32, i32) {
    %c0_i32 = arith.constant 0 : i32
    %c0_i32_0 = arith.constant 0 : i32
    %c0_i32_1 = arith.constant 0 : i32
    return %c0_i32, %c0_i32_0 : i32, i32
  }
  func.func @transform_2(%arg0: i32) -> (i32, i32) {
    %c0_i32 = arith.constant 0 : i32
    %c0_i32_0 = arith.constant 0 : i32
    return %arg0, %c0_i32 : i32, i32
  }
  func.func @transform_3(%arg0: i32) -> (i32, i32) {
    %c0_i32 = arith.constant 0 : i32
    %c0_i32_0 = arith.constant 0 : i32
    return %arg0, %c0_i32 : i32, i32
  }
}

</mosaic_0001>

<bundles_post_ra>
// kernel: tpu_custom_call.1
= control target key start
LH: loop header
LB: loop body
LE: loop exit
PB: predicated region body
PF: predicated region fallthrough
CT: control target
= control target key end

     0   :  { %s101_s0 = inlined_call_operand.<no memory space> [shape: f32[1,1], index: 0, kind: input, shape index: {}]   ;;  %s102_s1 = inlined_call_operand.<no memory space> [shape: f32[1,1], index: 1, kind: input, shape index: {}]   ;;  %s103_s2 = inlined_call_operand.vmem [shape: f32[1,128], index: 2, kind: input, shape index: {}]   ;;  %s104_s3 = inlined_call_operand.hbm [shape: f32[1,128], index: 3, kind: output, shape index: {}]  }
   0x1   :  { %v17_v0 = vld [vmem:[%s103_s2] sm:$0x1]  ;;  %v19_v1 = vstv %s101_s0  ;;  %v22_v2 = vstv %s102_s1 }
   0x2   :  { %10 = vsyncpa [#allocation5], 0  ;;  %s32_s20 = sshll.u32 %s104_s3, 4  ;;  %v20_v3 = vmul.f32 %v19_v1, %v17_v0  ;;  %s68_s21 = smov [#allocation4]   ;;  %s33_s20 = int_to_ptr.hbm [resolvable:$true] %s32_s20 }
   0x3   :  { %s30_s22 = sshll.u32 %s68_s21, 4  ;;  %s31_s22 = int_to_ptr.vmem [resolvable:$true] %s30_s22 }
   0x4   :  { %v23_v4 = vadd.f32 %v22_v2, %v20_v3 }
   0x6   :  { %24 = vst [vmem:[#allocation4] sm:$0x1] %v23_v4 }
   0x7   :  { %35 = dma.vmem_to_hbm [thread:$0]  %s31_s22, 16, %s33_s20, [#allocation5]  }
   0x8   :  { %66 = dma.done.wait [#allocation5], 16  }
   0x9   :  { %67 = vsyncadd [#allocation5], 4294967280 }
   0xa   :  { %40 = vsyncpa [#allocation5], 1 }

</bundles_post_ra>
